<compile_context>
chip_gen: v5e
topology: v5e:2x2
jax: 0.10.0
libtpu: 0.0.40
codegen_flags: <defaults>
</compile_context>

<pallas_src>
import jax
import jax.numpy as jnp
from jax.experimental import pallas as pl
from jax.experimental.pallas import tpu as pltpu

# ---- config-derived dims ----------------------------------------------------
ACTION_DIM = 5
ACTION_PAD = 8                        # small padded output width (full-dim block)
N_AGENTS = 2 + 2
N_OBSTACLES = 2 * 2
STATE_DIM = N_AGENTS * 3 + N_OBSTACLES        # = 16
HIDDEN = (512, 64, 16)

DEFAULT_BATCH_TILE = 2048             # rows per grid step (sweep 1024-2048)
TILE_ROW_ALIGN = 16                   # bf16 sublane packing
MIN_SPLIT_BATCH = 256                 # below this a multi-step grid is overhead


def _round_up(x, m):
    return (x + m - 1) // m * m


def _cdiv(a, b):
    return -(-a // b)


def dqn_unit_kernel(x_ref,
                    w1_ref, b1_ref, w2_ref, b2_ref,
                    w3_ref, b3_ref, w4_ref, b4_ref,
                    out_ref):
    """One batch tile of the fused 4-layer MLP.

    x_ref:   (TB, STATE_DIM)  f32 or bf16
    wK_ref:  (in, out)        bf16  (y = x @ W + b, PyTorch weight transposed)
    bK_ref:  (1, out)         f32
    out_ref: (TB, ACTION_PAD) f32   lanes >= ACTION_DIM are exactly zero
    """
    x = x_ref[...].astype(jnp.bfloat16)   # no-op when wrapper already cast

    h1 = jnp.dot(x, w1_ref[...], preferred_element_type=jnp.float32) + b1_ref[...]
    h1 = jnp.maximum(h1, 0.0).astype(jnp.bfloat16)

    h2 = jnp.dot(h1, w2_ref[...], preferred_element_type=jnp.float32) + b2_ref[...]
    h2 = jnp.maximum(h2, 0.0).astype(jnp.bfloat16)

    h3 = jnp.dot(h2, w3_ref[...], preferred_element_type=jnp.float32) + b3_ref[...]
    h3 = jnp.maximum(h3, 0.0).astype(jnp.bfloat16)

    out_ref[...] = (jnp.dot(h3, w4_ref[...], preferred_element_type=jnp.float32)
                    + b4_ref[...])


def dqn_unit_forward(x, params, *, batch_tile=DEFAULT_BATCH_TILE,
                     return_padded=False):
    """x: (B, STATE_DIM) -> Q-values (B, ACTION_DIM) f32.

    return_padded=True returns the raw (b_pad, ACTION_PAD) kernel output and
    skips the final slice (consumer must index [:B, :ACTION_DIM] itself).
    """
    (w1, b1), (w2, b2), (w3, b3), (w4, b4) = params
    batch = x.shape[0]

    # ---- padding-aware batch tiling -----------------------------------------
    n_steps = max(1, _cdiv(batch, batch_tile))
    if batch >= MIN_SPLIT_BATCH:
        n_steps = max(n_steps, 2)       # >=2 grid steps: both v7x TCs get work
    if n_steps > 1 and n_steps % 2:
        n_steps += 1                    # even step count -> balanced TC split
    tb = _round_up(_cdiv(max(batch, 1), n_steps), TILE_ROW_ALIGN)
    b_pad = n_steps * tb

    if b_pad != batch:
        # Pad and bf16-cast fuse into one XLA op; kernel then reads 32 B/row
        # instead of 64 B/row.
        x = jnp.pad(x.astype(jnp.bfloat16), ((0, b_pad - batch), (0, 0)))
    # else: pass through as-is; the in-kernel cast is a free VPU op and we
    # avoid an extra un-hidden wrapper copy.

    def resident(arr):
        # Full-array block + constant index map: weight stays VMEM-resident
        # across all grid steps (DMA'd once, never re-fetched).
        return pl.BlockSpec(arr.shape, lambda i: (0, 0))

    out = pl.pallas_call(
        dqn_unit_kernel,
        out_shape=jax.ShapeDtypeStruct((b_pad, ACTION_PAD), jnp.float32),
        grid_spec=pltpu.PrefetchScalarGridSpec(
            num_scalar_prefetch=0,
            grid=(n_steps,),
            in_specs=[
                pl.BlockSpec((tb, STATE_DIM), lambda i: (i, 0)),
                resident(w1), resident(b1),
                resident(w2), resident(b2),
                resident(w3), resident(b3),
                resident(w4), resident(b4),
            ],
            out_specs=pl.BlockSpec((tb, ACTION_PAD), lambda i: (i, 0)),
        ),
        compiler_params=pltpu.CompilerParams(
            dimension_semantics=("parallel",)),
    )(x, w1, b1, w2, b2, w3, b3, w4, b4)

    if return_padded:
        return out  # rows >= batch are dead; lanes >= ACTION_DIM are zero
    return out[:batch, :ACTION_DIM]


def init_params(key):
    """Deterministic init (uniform +/- 1/sqrt(fan_in), like nn.Linear default).

    Weights stored as (in, out) bf16; biases (1, out) f32.
    Final layer is zero-padded to ACTION_PAD output lanes.
    """
    dims = (STATE_DIM,) + HIDDEN + (ACTION_DIM,)
    params = []
    for i in range(len(dims) - 1):
        d_in, d_out = dims[i], dims[i + 1]
        key, kw, kb = jax.random.split(key, 3)
        bound = float(d_in) ** -0.5
        w = jax.random.uniform(kw, (d_in, d_out), jnp.float32, -bound, bound)
        b = jax.random.uniform(kb, (1, d_out), jnp.float32, -bound, bound)
        if i == len(dims) - 2:  # last layer: pad to ACTION_PAD output lanes
            w = jnp.pad(w, ((0, 0), (0, ACTION_PAD - d_out)))
            b = jnp.pad(b, ((0, 0), (0, ACTION_PAD - d_out)))
        params.append((w.astype(jnp.bfloat16), b))
    return params


def ref_forward(x, params):
    """Pure-JAX reference with identical (bf16-weight, f32-accum) numerics."""
    # TODO(synk): the true PyTorch DQNUnit is full f32; bf16 weights/activations
    # here are within ~1e-2 of it, verify tolerance if used for TD targets.
    (w1, b1), (w2, b2), (w3, b3), (w4, b4) = params
    h = x.astype(jnp.bfloat16)
    h = jnp.maximum(jnp.dot(h, w1, preferred_element_type=jnp.float32) + b1, 0.0)
    h = jnp.maximum(jnp.dot(h.astype(jnp.bfloat16), w2,
                            preferred_element_type=jnp.float32) + b2, 0.0)
    h = jnp.maximum(jnp.dot(h.astype(jnp.bfloat16), w3,
                            preferred_element_type=jnp.float32) + b3, 0.0)
    out = jnp.dot(h.astype(jnp.bfloat16), w4,
                  preferred_element_type=jnp.float32) + b4
    return out[:, :ACTION_DIM]


if __name__ == "__main__":
    key = jax.random.PRNGKey(0)
    k_x, k_p = jax.random.split(key)
    params = init_params(k_p)

    # Small case (single grid step, batch padded 8 -> 16).
    batch = 8
    x = jax.random.normal(k_x, (batch, STATE_DIM), jnp.float32)
    out = jax.block_until_ready(dqn_unit_forward(x, params))
    assert out.shape == (batch, ACTION_DIM)
    ref = ref_forward(x, params)
    assert jnp.allclose(out, ref, atol=2e-2, rtol=2e-2), \
        float(jnp.max(jnp.abs(out - ref)))

    # Multi-step grid + padding-aware tiling (520 -> 2 steps of 272, pad to 544).
    batch2 = 520
    x2 = jax.random.normal(k_x, (batch2, STATE_DIM), jnp.float32)
    out2 = jax.block_until_ready(dqn_unit_forward(x2, params))
    assert out2.shape == (batch2, ACTION_DIM)
    ref2 = ref_forward(x2, params)
    assert jnp.allclose(out2, ref2, atol=2e-2, rtol=2e-2), \
        float(jnp.max(jnp.abs(out2 - ref2)))

    # No-padding path (batch multiple of 16, single step, f32 passthrough).
    batch3 = 64
    x3 = jax.random.normal(k_x, (batch3, STATE_DIM), jnp.float32)
    out3 = jax.block_until_ready(dqn_unit_forward(x3, params))
    assert out3.shape == (batch3, ACTION_DIM)
    ref3 = ref_forward(x3, params)
    assert jnp.allclose(out3, ref3, atol=2e-2, rtol=2e-2), \
        float(jnp.max(jnp.abs(out3 - ref3)))

    print("KERNEL_OK")
</pallas_src>

<mosaic_0001>
module attributes {stable_mosaic.version = 11 : i64} {
  func.func @dqn_unit_kernel(%arg0: i32, %arg1: memref<16x16xbf16, #tpu.memory_space<vmem>>, %arg2: memref<16x512xbf16, #tpu.memory_space<vmem>>, %arg3: memref<1x512xf32, #tpu.memory_space<vmem>>, %arg4: memref<512x64xbf16, #tpu.memory_space<vmem>>, %arg5: memref<1x64xf32, #tpu.memory_space<vmem>>, %arg6: memref<64x16xbf16, #tpu.memory_space<vmem>>, %arg7: memref<1x16xf32, #tpu.memory_space<vmem>>, %arg8: memref<16x8xbf16, #tpu.memory_space<vmem>>, %arg9: memref<1x8xf32, #tpu.memory_space<vmem>>, %arg10: memref<16x8xf32, #tpu.memory_space<vmem>>) attributes {dimension_semantics = [#tpu.dimension_semantics<parallel>], iteration_bounds = array<i64: 1>, scalar_prefetch = 0 : i64, scratch_operands = 0 : i64, tpu.core_type = #tpu.core_type<tc>, window_params = [{transform_indices = @transform_0, window_bounds = array<i64: 16, 16>}, {pipeline_mode = #tpu.pipeline_mode<synchronous>, transform_indices = @transform_1, window_bounds = array<i64: 16, 512>}, {pipeline_mode = #tpu.pipeline_mode<synchronous>, transform_indices = @transform_2, window_bounds = array<i64: 1, 512>}, {pipeline_mode = #tpu.pipeline_mode<synchronous>, transform_indices = @transform_3, window_bounds = array<i64: 512, 64>}, {pipeline_mode = #tpu.pipeline_mode<synchronous>, transform_indices = @transform_4, window_bounds = array<i64: 1, 64>}, {pipeline_mode = #tpu.pipeline_mode<synchronous>, transform_indices = @transform_5, window_bounds = array<i64: 64, 16>}, {pipeline_mode = #tpu.pipeline_mode<synchronous>, transform_indices = @transform_6, window_bounds = array<i64: 1, 16>}, {pipeline_mode = #tpu.pipeline_mode<synchronous>, transform_indices = @transform_7, window_bounds = array<i64: 16, 8>}, {pipeline_mode = #tpu.pipeline_mode<synchronous>, transform_indices = @transform_8, window_bounds = array<i64: 1, 8>}, {transform_indices = @transform_9, window_bounds = array<i64: 16, 8>}]} {
    %c0 = arith.constant 0 : index
    %c0_0 = arith.constant 0 : index
    %0 = vector.load %arg1[%c0, %c0_0] : memref<16x16xbf16, #tpu.memory_space<vmem>>, vector<16x16xbf16>
    %c0_1 = arith.constant 0 : index
    %c0_2 = arith.constant 0 : index
    %1 = vector.load %arg2[%c0_1, %c0_2] : memref<16x512xbf16, #tpu.memory_space<vmem>>, vector<16x512xbf16>
    %cst = arith.constant dense<0.000000e+00> : vector<16x512xf32>
    %2 = tpu.matmul %0, %1, %cst {dimension_numbers = #tpu.dot_dimension_numbers<[1], [0], [0], [1], [0, 0, 1, 1], [], []>} : vector<16x16xbf16>, vector<16x512xbf16>, vector<16x512xf32> -> vector<16x512xf32>
    %c0_3 = arith.constant 0 : index
    %c0_4 = arith.constant 0 : index
    %3 = vector.load %arg3[%c0_3, %c0_4] : memref<1x512xf32, #tpu.memory_space<vmem>>, vector<1x512xf32>
    %4 = vector.broadcast %3 : vector<1x512xf32> to vector<16x512xf32>
    %5 = arith.addf %2, %4 : vector<16x512xf32>
    %cst_5 = arith.constant 0.000000e+00 : f32
    %6 = vector.broadcast %cst_5 : f32 to vector<16x512xf32>
    %7 = arith.maximumf %5, %6 : vector<16x512xf32>
    %8 = arith.truncf %7 : vector<16x512xf32> to vector<16x512xbf16>
    %c0_6 = arith.constant 0 : index
    %c0_7 = arith.constant 0 : index
    %9 = vector.load %arg4[%c0_6, %c0_7] : memref<512x64xbf16, #tpu.memory_space<vmem>>, vector<512x64xbf16>
    %cst_8 = arith.constant dense<0.000000e+00> : vector<16x64xf32>
    %10 = tpu.matmul %8, %9, %cst_8 {dimension_numbers = #tpu.dot_dimension_numbers<[1], [0], [0], [1], [0, 0, 1, 1], [], []>} : vector<16x512xbf16>, vector<512x64xbf16>, vector<16x64xf32> -> vector<16x64xf32>
    %c0_9 = arith.constant 0 : index
    %c0_10 = arith.constant 0 : index
    %11 = vector.load %arg5[%c0_9, %c0_10] : memref<1x64xf32, #tpu.memory_space<vmem>>, vector<1x64xf32>
    %12 = vector.broadcast %11 : vector<1x64xf32> to vector<16x64xf32>
    %13 = arith.addf %10, %12 : vector<16x64xf32>
    %cst_11 = arith.constant 0.000000e+00 : f32
    %14 = vector.broadcast %cst_11 : f32 to vector<16x64xf32>
    %15 = arith.maximumf %13, %14 : vector<16x64xf32>
    %16 = arith.truncf %15 : vector<16x64xf32> to vector<16x64xbf16>
    %c0_12 = arith.constant 0 : index
    %c0_13 = arith.constant 0 : index
    %17 = vector.load %arg6[%c0_12, %c0_13] : memref<64x16xbf16, #tpu.memory_space<vmem>>, vector<64x16xbf16>
    %cst_14 = arith.constant dense<0.000000e+00> : vector<16x16xf32>
    %18 = tpu.matmul %16, %17, %cst_14 {dimension_numbers = #tpu.dot_dimension_numbers<[1], [0], [0], [1], [0, 0, 1, 1], [], []>} : vector<16x64xbf16>, vector<64x16xbf16>, vector<16x16xf32> -> vector<16x16xf32>
    %c0_15 = arith.constant 0 : index
    %c0_16 = arith.constant 0 : index
    %19 = vector.load %arg7[%c0_15, %c0_16] : memref<1x16xf32, #tpu.memory_space<vmem>>, vector<1x16xf32>
    %20 = vector.broadcast %19 : vector<1x16xf32> to vector<16x16xf32>
    %21 = arith.addf %18, %20 : vector<16x16xf32>
    %cst_17 = arith.constant 0.000000e+00 : f32
    %22 = vector.broadcast %cst_17 : f32 to vector<16x16xf32>
    %23 = arith.maximumf %21, %22 : vector<16x16xf32>
    %24 = arith.truncf %23 : vector<16x16xf32> to vector<16x16xbf16>
    %c0_18 = arith.constant 0 : index
    %c0_19 = arith.constant 0 : index
    %25 = vector.load %arg8[%c0_18, %c0_19] : memref<16x8xbf16, #tpu.memory_space<vmem>>, vector<16x8xbf16>
    %cst_20 = arith.constant dense<0.000000e+00> : vector<16x8xf32>
    %26 = tpu.matmul %24, %25, %cst_20 {dimension_numbers = #tpu.dot_dimension_numbers<[1], [0], [0], [1], [0, 0, 1, 1], [], []>} : vector<16x16xbf16>, vector<16x8xbf16>, vector<16x8xf32> -> vector<16x8xf32>
    %c0_21 = arith.constant 0 : index
    %c0_22 = arith.constant 0 : index
    %27 = vector.load %arg9[%c0_21, %c0_22] : memref<1x8xf32, #tpu.memory_space<vmem>>, vector<1x8xf32>
    %28 = vector.broadcast %27 : vector<1x8xf32> to vector<16x8xf32>
    %29 = arith.addf %26, %28 : vector<16x8xf32>
    %c0_23 = arith.constant 0 : index
    %c0_24 = arith.constant 0 : index
    %30 = vector.load %arg10[%c0_23, %c0_24] : memref<16x8xf32, #tpu.memory_space<vmem>>, vector<16x8xf32>
    tpu.vector_store %arg10[%c0_23, %c0_24], %29 {strides = array<i32>} : memref<16x8xf32, #tpu.memory_space<vmem>>, vector<16x8xf32>,
    return
  }
  func.func @transform_0(%arg0: i32) -> (i32, i32) {
    %c0_i32 = arith.constant 0 : i32
    %c0_i32_0 = arith.constant 0 : i32
    return %arg0, %c0_i32 : i32, i32
  }
  func.func @transform_1(%arg0: i32) -> (i32, i32) {
    %c0_i32 = arith.constant 0 : i32
    %c0_i32_0 = arith.constant 0 : i32
    %c0_i32_1 = arith.constant 0 : i32
    return %c0_i32, %c0_i32_0 : i32, i32
  }
  func.func @transform_2(%arg0: i32) -> (i32, i32) {
    %c0_i32 = arith.constant 0 : i32
    %c0_i32_0 = arith.constant 0 : i32
    %c0_i32_1 = arith.constant 0 : i32
    return %c0_i32, %c0_i32_0 : i32, i32
  }
  func.func @transform_3(%arg0: i32) -> (i32, i32) {
    %c0_i32 = arith.constant 0 : i32
    %c0_i32_0 = arith.constant 0 : i32
    %c0_i32_1 = arith.constant 0 : i32
    return %c0_i32, %c0_i32_0 : i32, i32
  }
  func.func @transform_4(%arg0: i32) -> (i32, i32) {
    %c0_i32 = arith.constant 0 : i32
    %c0_i32_0 = arith.constant 0 : i32
    %c0_i32_1 = arith.constant 0 : i32
    return %c0_i32, %c0_i32_0 : i32, i32
  }
  func.func @transform_5(%arg0: i32) -> (i32, i32) {
    %c0_i32 = arith.constant 0 : i32
    %c0_i32_0 = arith.constant 0 : i32
    %c0_i32_1 = arith.constant 0 : i32
    return %c0_i32, %c0_i32_0 : i32, i32
  }
  func.func @transform_6(%arg0: i32) -> (i32, i32) {
    %c0_i32 = arith.constant 0 : i32
    %c0_i32_0 = arith.constant 0 : i32
    %c0_i32_1 = arith.constant 0 : i32
    return %c0_i32, %c0_i32_0 : i32, i32
  }
  func.func @transform_7(%arg0: i32) -> (i32, i32) {
    %c0_i32 = arith.constant 0 : i32
    %c0_i32_0 = arith.constant 0 : i32
    %c0_i32_1 = arith.constant 0 : i32
    return %c0_i32, %c0_i32_0 : i32, i32
  }
  func.func @transform_8(%arg0: i32) -> (i32, i32) {
    %c0_i32 = arith.constant 0 : i32
    %c0_i32_0 = arith.constant 0 : i32
    %c0_i32_1 = arith.constant 0 : i32
    return %c0_i32, %c0_i32_0 : i32, i32
  }
  func.func @transform_9(%arg0: i32) -> (i32, i32) {
    %c0_i32 = arith.constant 0 : i32
    %c0_i32_0 = arith.constant 0 : i32
    return %arg0, %c0_i32 : i32, i32
  }
}

</mosaic_0001>

<bundles_post_ra>
// kernel: tpu_custom_call.1
= control target key start
LH: loop header
LB: loop body
LE: loop exit
PB: predicated region body
PF: predicated region fallthrough
CT: control target
= control target key end

     0   :  { %vm74_vm0 = vcmask 130048   ;;  %vm501_vm1 = vcmask 523264   ;;  %vm551_vm2 = vcmask 64512   ;;  %s988_s1 = inlined_call_operand.vmem [shape: bf16[16,512], index: 1, kind: input, shape index: {}]   ;;  %s989_s0 = inlined_call_operand.vmem [shape: bf16[16,16], index: 0, kind: input, shape index: {}]   ;;  %s990_s3 = inlined_call_operand.vmem [shape: bf16[512,64], index: 3, kind: input, shape index: {}]   ;;  %s991_s4 = inlined_call_operand.vmem [shape: f32[1,64], index: 4, kind: input, shape index: {}]   ;;  %s992_s2 = inlined_call_operand.vmem [shape: f32[1,512], index: 2, kind: input, shape index: {}]   ;;  %s993_s6 = inlined_call_operand.vmem [shape: f32[1,16], index: 6, kind: input, shape index: {}]   ;;  %s994_s5 = inlined_call_operand.vmem [shape: bf16[64,16], index: 5, kind: input, shape index: {}]   ;;  %s995_s7 = inlined_call_operand.vmem [shape: bf16[16,8], index: 7, kind: input, shape index: {}]   ;;  %s996_s8 = inlined_call_operand.vmem [shape: f32[1,8], index: 8, kind: input, shape index: {}]   ;;  %s997_s9 = inlined_call_operand.vmem [shape: f32[16,8], index: 9, kind: output, shape index: {}]  }
   0x1   :  { %v564_v0 = vld [vmem:[%s988_s1] sm:$0xf]  ;;  %v735_v1 = vld [vmem:[%s988_s1 + $0xc] sm:$0xf0]  ;;  %v733_v2 = vld [vmem:[%s988_s1 + $0x4] sm:$0xf] }
   0x2   :  { %v565_v3 = vor.u32 %v735_v1, %v564_v0  ;;  %v566_v4 = vld [vmem:[%s988_s1 + $0x10] sm:$0xf0]  ;;  %v572_v5 = vld [vmem:[%s988_s1 + $0x8] sm:$0xf]  ;;  %v736_v6 = vld [vmem:[%s988_s1 + $0x14] sm:$0xf0] }
   0x3   :  { %v569_v7 = vor.u32 %v733_v2, %v566_v4  ;;  %v573_v8 = vor.u32 %v736_v6, %v572_v5  ;;  %v734_v9 = vld [vmem:[%s988_s1 + $0xc] sm:$0xf]  ;;  %v574_v10 = vld [vmem:[%s988_s1 + $0x18] sm:$0xf0]  ;;  %v732_v11 = vld [vmem:[%s989_s0] sm:$0xff] }
   0x4   :  { %85 = vmatpush.bf16.msra.mxu0 %v565_v3  ;;  %v577_v12 = vor.u32 %v734_v9, %v574_v10  ;;  %v744_v13 = vld [vmem:[%s990_s3 + $0x38] sm:$0xff]  ;;  %v743_v16 = vld [vmem:[%s990_s3 + $0x30] sm:$0xff]  ;;  %v742_v20 = vld [vmem:[%s990_s3 + $0x28] sm:$0xff] }
   0x5   :  { %v752_v14 = vld [vmem:[%s990_s3 + $0x78] sm:$0xff]  ;;  %99 = vmatpush.bf16.msra.mxu1 %v569_v7  ;;  %113 = vmatpush.bf16.msra.mxu2 %v573_v8  ;;  %v751_v18 = vld [vmem:[%s990_s3 + $0x70] sm:$0xff]  ;;  %v750_v22 = vld [vmem:[%s990_s3 + $0x68] sm:$0xff] }
   0x6   :  { %v760_v15 = vld [vmem:[%s990_s3 + $0xb8] sm:$0xff]  ;;  %127 = vmatpush.bf16.msra.mxu3 %v577_v12  ;;  %v759_v19 = vld [vmem:[%s990_s3 + $0xb0] sm:$0xff]  ;;  %v758_v23 = vld [vmem:[%s990_s3 + $0xa8] sm:$0xff] }
   0x7   :  { %v768_v17 = vld [vmem:[%s990_s3 + $0xf8] sm:$0xff]  ;;  %578 = vmatmul.msk.bf16.vlgmr.msra.gmra.mxu0 %vm74_vm0, %v732_v11  ;;  %v767_v21 = vld [vmem:[%s990_s3 + $0xf0] sm:$0xff]  ;;  %v741_v24 = vld [vmem:[%s990_s3 + $0x20] sm:$0xff] }
   0x8   :  { %406 = vmatpush.bf16.msrb.mxu0 %v744_v13  ;;  %579 = vmatmul.msk.bf16.vlgmr.msra.gmra.mxu1 %vm74_vm0, %v732_v11  ;;  %v766_v25 = vld [vmem:[%s990_s3 + $0xe8] sm:$0xff]  ;;  %v749_v26 = vld [vmem:[%s990_s3 + $0x60] sm:$0xff]  ;;  %v740_v27 = vld [vmem:[%s990_s3 + $0x18] sm:$0xff] }
   0x9   :  { %420 = vmatpush.bf16.msrb.mxu1 %v752_v14  ;;  %580 = vmatmul.msk.bf16.vlgmr.msra.gmra.mxu2 %vm74_vm0, %v732_v11  ;;  %v748_v28 = vld [vmem:[%s990_s3 + $0x58] sm:$0xff]  ;;  %v757_v29 = vld [vmem:[%s990_s3 + $0xa0] sm:$0xff]  ;;  %v739_v31 = vld [vmem:[%s990_s3 + $0x10] sm:$0xff] }
   0xa   :  { %581 = vmatmul.msk.bf16.vlgmr.msra.gmra.mxu3 %vm74_vm0, %v732_v11  ;;  %434 = vmatpush.bf16.msrb.mxu2 %v760_v15  ;;  %v765_v30 = vld [vmem:[%s990_s3 + $0xe0] sm:$0xff]  ;;  %v747_v32 = vld [vmem:[%s990_s3 + $0x50] sm:$0xff]  ;;  %v756_v33 = vld [vmem:[%s990_s3 + $0x98] sm:$0xff] }
   0xb   :  { %448 = vmatpush.bf16.msrb.mxu3 %v768_v17  ;;  %v764_v34 = vld [vmem:[%s990_s3 + $0xd8] sm:$0xff]  ;;  %v738_v35 = vld [vmem:[%s990_s3 + $0x8] sm:$0xff]  ;;  %v755_v37 = vld [vmem:[%s990_s3 + $0x90] sm:$0xff] }
   0xc   :  { %407 = vmatpush.bf16.msrb.mxu0 %v743_v16  ;;  %v746_v36 = vld [vmem:[%s990_s3 + $0x48] sm:$0xff]  ;;  %v763_v38 = vld [vmem:[%s990_s3 + $0xd0] sm:$0xff]  ;;  %v737_v39 = vld [vmem:[%s990_s3] sm:$0xff] }
   0xd   :  { %421 = vmatpush.bf16.msrb.mxu1 %v751_v18  ;;  %v745_v40 = vld [vmem:[%s990_s3 + $0x40] sm:$0xff]  ;;  %v754_v41 = vld [vmem:[%s990_s3 + $0x88] sm:$0xff]  ;;  %v772_v14 = vld [vmem:[%s994_s5 + $0x18] sm:$0xff] }
   0xe   :  { %435 = vmatpush.bf16.msrb.mxu2 %v759_v19  ;;  %v762_v42 = vld [vmem:[%s990_s3 + $0xc8] sm:$0xff]  ;;  %v753_v43 = vld [vmem:[%s990_s3 + $0x80] sm:$0xff]  ;;  %v771_v15 = vld [vmem:[%s994_s5 + $0x10] sm:$0xff] }
   0xf   :  { %449 = vmatpush.bf16.msrb.mxu3 %v767_v21  ;;  %v761_v44 = vld [vmem:[%s990_s3 + $0xc0] sm:$0xff]  ;;  %v770_v16 = vld [vmem:[%s994_s5 + $0x8] sm:$0xff] }
  0x10   :  { %408 = vmatpush.bf16.msrb.mxu0 %v742_v20  ;;  %v39_v45 = vld [vmem:[%s992_s2] sm:$0xf] }
  0x11   :  { %422 = vmatpush.bf16.msrb.mxu1 %v750_v22  ;;  %v41_v47 = vperm.slane %v39_v45, 0  ;;  %v42_v49 = vperm.slane %v39_v45, 1  ;;  %v43_v59 = vperm.slane %v39_v45, 2  ;;  %v44_v61 = vperm.slane %v39_v45, 3  ;;  %v769_v17 = vld [vmem:[%s994_s5] sm:$0xff] }
  0x12   :  { %436 = vmatpush.bf16.msrb.mxu2 %v758_v23  ;;  %v773_v18 = vld [vmem:[%s995_s7] sm:$0xff] }
  0x13   :  { %450 = vmatpush.bf16.msrb.mxu3 %v766_v25  ;;  %v774_v20 = vld [vmem:[%s991_s4] ss:$0 sm:$0xff] }
  0x14   :  { %409 = vmatpush.bf16.msrb.mxu0 %v741_v24 }
  0x15   :  { %423 = vmatpush.bf16.msrb.mxu1 %v749_v26 }
  0x16   :  { %437 = vmatpush.bf16.msrb.mxu2 %v757_v29 }
  0x17   :  { %451 = vmatpush.bf16.msrb.mxu3 %v765_v30 }
  0x18   :  { %410 = vmatpush.bf16.msrb.mxu0 %v740_v27 }
  0x19   :  { %424 = vmatpush.bf16.msrb.mxu1 %v748_v28 }
  0x1a   :  { %438 = vmatpush.bf16.msrb.mxu2 %v756_v33 }
  0x1b   :  { %452 = vmatpush.bf16.msrb.mxu3 %v764_v34 }
  0x1c   :  { %411 = vmatpush.bf16.msrb.mxu0 %v739_v31 }
  0x1d   :  { %425 = vmatpush.bf16.msrb.mxu1 %v747_v32 }
  0x1e   :  { %439 = vmatpush.bf16.msrb.mxu2 %v755_v37 }
  0x1f   :  { %453 = vmatpush.bf16.msrb.mxu3 %v763_v38 }
  0x20   :  { %412 = vmatpush.bf16.msrb.mxu0 %v738_v35 }
  0x21   :  { %426 = vmatpush.bf16.msrb.mxu1 %v746_v36 }
  0x22   :  { %440 = vmatpush.bf16.msrb.mxu2 %v754_v41 }
  0x23   :  { %454 = vmatpush.bf16.msrb.mxu3 %v762_v42 }
  0x24   :  { %413 = vmatpush.bf16.msrb.mxu0 %v737_v39 }
  0x25   :  { %427 = vmatpush.bf16.msrb.mxu1 %v745_v40  ;;  %v775_v40 = vld [vmem:[%s993_s6] ss:$0 sm:$0xff] }
  0x26   :  { %441 = vmatpush.bf16.msrb.mxu2 %v753_v43 }
  0x27   :  { %455 = vmatpush.bf16.msrb.mxu3 %v761_v44 }
  0x28   :  { %509 = vmatpush.bf16.msra.mxu0 %v772_v14 }
  0x29   :  { %544 = vmatpush.bf16.msra.mxu1 %v773_v18 }
  0x2c   :  { %510 = vmatpush.bf16.msra.mxu0 %v771_v15 }
  0x30   :  { %511 = vmatpush.bf16.msra.mxu0 %v770_v16 }
  0x34   :  { %512 = vmatpush.bf16.msra.mxu0 %v769_v17 }
  0x84   :  { %v87_v46 = vpop.f32.mrf.mxu0 }
  0x85   :  { %v101_v48 = vpop.f32.mrf.mxu1  ;;  %v88_v50 = vadd.f32 %v87_v46, %v41_v47 }
  0x86   :  { %v102_v51 = vadd.f32 %v101_v48, %v42_v49 }
  0x87   :  { %v134_v55 = vmax.f32 %v88_v50, 0.0 }
  0x88   :  { %v135_v58 = vmax.f32 %v102_v51, 0.0 }
  0x8c   :  { %v115_v52 = vpop.f32.mrf.mxu2  ;;  %v89_v54 = vpop.f32.mrf.mxu0 }
  0x8d   :  { %v129_v53 = vpop.f32.mrf.mxu3  ;;  %v90_v56 = vadd.f32 %v89_v54, %v41_v47  ;;  %v103_v57 = vpop.f32.mrf.mxu1  ;;  %v116_v1 = vadd.f32 %v115_v52, %v43_v59  ;;  %v776_v47 = vld [vmem:[%s996_s8] ss:$0 sm:$0xff] }
  0x8e   :  { %v104_v60 = vadd.f32 %v103_v57, %v42_v49  ;;  %v130_v3 = vadd.f32 %v129_v53, %v44_v61 }
  0x8f   :  { %v138_v62 = vmax.f32 %v90_v56, 0.0  ;;  %v136_v8 = vmax.f32 %v116_v1, 0.0 }
  0x90   :  { %v139_v63 = vmax.f32 %v104_v60, 0.0  ;;  %v137_v10 = vmax.f32 %v130_v3, 0.0 }
  0x91   :  { %v142_v0 = vpack.c.bf16 %v138_v62, %v134_v55 }
  0x92   :  { %v143_v2 = vpack.c.bf16 %v139_v63, %v135_v58 }
  0x93   :  { %414 = vmatmul.bf16.vlgmr.msrb.gmra.mxu0 %v142_v0 }
  0x94   :  { %v117_v4 = vpop.f32.mrf.mxu2  ;;  %428 = vmatmul.bf16.vlgmr.msrb.gmra.mxu1 %v143_v2 }
  0x95   :  { %v118_v5 = vadd.f32 %v117_v4, %v43_v59  ;;  %v131_v6 = vpop.f32.mrf.mxu3 }
  0x96   :  { %v132_v7 = vadd.f32 %v131_v6, %v44_v61 }
  0x97   :  { %v140_v9 = vmax.f32 %v118_v5, 0.0 }
  0x98   :  { %v141_v11 = vmax.f32 %v132_v7, 0.0 }
  0x99   :  { %v144_v12 = vpack.c.bf16 %v140_v9, %v136_v8 }
  0x9a   :  { %v145_v13 = vpack.c.bf16 %v141_v11, %v137_v10 }
  0x9b   :  { %442 = vmatmul.bf16.vlgmr.msrb.gmra.mxu2 %v144_v12 }
  0x9c   :  { %456 = vmatmul.bf16.vlgmr.msrb.gmra.mxu3 %v145_v13 }
 0x110   :  { %v415_v19 = vpop.f32.mrf.mxu0 }
 0x111   :  { %v429_v21 = vpop.f32.mrf.mxu1  ;;  %v416_v22 = vadd.f32 %v774_v20, %v415_v19 }
 0x113   :  { %v430_v26 = vadd.f32 %v429_v21, %v416_v22 }
 0x118   :  { %v417_v23 = vpop.f32.mrf.mxu0 }
 0x119   :  { %v418_v27 = vadd.f32 %v774_v20, %v417_v23  ;;  %v431_v29 = vpop.f32.mrf.mxu1 }
 0x11b   :  { %v432_v30 = vadd.f32 %v431_v29, %v418_v27 }
 0x11e   :  { %v443_v24 = vpop.f32.mrf.mxu2 }
 0x11f   :  { %v457_v25 = vpop.f32.mrf.mxu3  ;;  %v444_v28 = vadd.f32 %v443_v24, %v430_v26 }
 0x121   :  { %v458_v32 = vadd.f32 %v457_v25, %v444_v28 }
 0x123   :  { %v462_v36 = vmax.f32 %v458_v32, 0.0 }
 0x126   :  { %v445_v31 = vpop.f32.mrf.mxu2 }
 0x127   :  { %v446_v33 = vadd.f32 %v445_v31, %v432_v30  ;;  %v459_v34 = vpop.f32.mrf.mxu3 }
 0x129   :  { %v460_v35 = vadd.f32 %v459_v34, %v446_v33 }
 0x12b   :  { %v463_v37 = vmax.f32 %v460_v35, 0.0 }
 0x12d   :  { %v464_v38 = vpack.c.bf16 %v463_v37, %v462_v36 }
 0x12f   :  { %726 = vmatmul.msk.bf16.vlgmr.msra.gmra.mxu0 %vm501_vm1, %v464_v38 }
 0x1ac   :  { %v514_v39 = vpop.f32.mrf.mxu0 }
 0x1ad   :  { %v515_v41 = vadd.f32 %v775_v40, %v514_v39 }
 0x1af   :  { %v519_v44 = vmax.f32 %v515_v41, 0.0 }
 0x1b4   :  { %v516_v42 = vpop.f32.mrf.mxu0 }
 0x1b5   :  { %v517_v43 = vadd.f32 %v775_v40, %v516_v42 }
 0x1b7   :  { %v520_v45 = vmax.f32 %v517_v43, 0.0 }
 0x1b9   :  { %v521_v46 = vpack.c.bf16 %v520_v45, %v519_v44 }
 0x1bb   :  { %731 = vmatmul.msk.bf16.vlgmr.msra.gmra.mxu1 %vm74_vm0, %v521_v46 }
 0x238   :  { %v546_v48 = vpop.f32.mrf.mxu1 }
 0x239   :  { %v547_v49 = vadd.f32 %v776_v47, %v546_v48 }
 0x23b   :  { %552 = vst.msk [vmem:[%s997_s9] sm:$0xff] %vm551_vm2, %v547_v49 }
 0x240   :  { %v548_v50 = vpop.f32.mrf.mxu1 }
 0x241   :  { %v549_v51 = vadd.f32 %v776_v47, %v548_v50 }
 0x243   :  { %553 = vst.msk [vmem:[%s997_s9 + $0x8] sm:$0xff] %vm551_vm2, %v549_v51 }

</bundles_post_ra>
